<compile_context>
chip_gen: v7x
topology: tpu7x:2x2x1
jax: 0.10.0
libtpu: 0.0.40
codegen_flags: <defaults>
</compile_context>

<pallas_src>
import jax
import jax.numpy as jnp
from jax.experimental import pallas as pl
from jax.experimental.pallas import tpu as pltpu


def _round_up(x, m):
    return ((x + m - 1) // m) * m


def _linear_kernel(x_ref, w_ref, b_ref, o_ref):
    # (tm, H) @ (H, E) on the MXU with f32 accumulation, then a broadcast bias add
    # on the VPU. Output block is (tm, E) with E == full last dim of the output array.
    acc = jnp.dot(x_ref[...], w_ref[...], preferred_element_type=jnp.float32)
    o_ref[...] = (acc + b_ref[...]).astype(o_ref.dtype)


def pack_params(weight, bias):
    """Pack nn.Linear params once (hoisted out of the per-call path).

    weight: (E, H) in PyTorch nn.Linear layout, bias: (E,)
    returns: w_t (H, E), b_row (1, E)
    """
    w_t = jnp.asarray(weight).T
    b_row = jnp.asarray(bias).reshape(1, -1)
    return w_t, b_row


def emotion_classifier_forward_packed(x, w_t, b_row, *, tm_max=4096):
    """
    x:     (B, S, H) float32
    w_t:   (H, E)    float32   (pre-packed weight.T)
    b_row: (1, E)    float32   (pre-packed bias)
    returns (B, S, E) float32
    """
    B, S, H = x.shape
    E = w_t.shape[1]
    M = B * S

    # Row tile over M: sublane-aligned (f32 -> multiple of 8), capped at tm_max.
    # For M > 1024 clamp so the grid has >= 2 steps (v7x: both TensorCores get work).
    if M > 1024:
        tm = min(tm_max, _round_up(pl.cdiv(M, 2), 8))
    else:
        tm = min(tm_max, _round_up(M, 8))
    grid = (pl.cdiv(M, tm),)

    # No jnp.pad of x: ragged last tile is masked by Pallas (rows independent,
    # out-of-bounds output rows are dropped on writeback).
    x2d = x.reshape(M, H)

    cost = pl.CostEstimate(
        flops=2 * M * H * E,
        transcendentals=0,
        bytes_accessed=4 * (M * H + H * E + E + M * E),
    )

    out2d = pl.pallas_call(
        _linear_kernel,
        out_shape=jax.ShapeDtypeStruct((M, E), x.dtype),
        grid=grid,
        in_specs=[
            # Activations: one (tm, H) row tile per grid step (H is the full dim).
            pl.BlockSpec((tm, H), lambda i: (i, 0)),
            # Weight & bias: same block every step -> resident in VMEM across the grid.
            pl.BlockSpec((H, E), lambda i: (0, 0)),
            pl.BlockSpec((1, E), lambda i: (0, 0)),
        ],
        out_specs=pl.BlockSpec((tm, E), lambda i: (i, 0)),
        compiler_params=pltpu.CompilerParams(
            dimension_semantics=("parallel",),
        ),
        cost_estimate=cost,
    )(x2d, w_t, b_row)

    return out2d.reshape(B, S, E)


def emotion_classifier_forward(x, weight, bias, *, tm_max=4096):
    """Convenience wrapper: packs params and runs the kernel.

    In production, call pack_params() once at parameter-load time and reuse
    emotion_classifier_forward_packed() per step.
    """
    w_t, b_row = pack_params(weight, bias)
    return emotion_classifier_forward_packed(x, w_t, b_row, tm_max=tm_max)


if __name__ == "__main__":
    # Small, deterministic setup consistent with the module:
    #   hidden_size (H) = 32, n_emotion (E) = 5, batch = 2, seq = 8
    B, S, H, E = 2, 8, 32, 5

    key = jax.random.PRNGKey(0)
    kx, kw, kb = jax.random.split(key, 3)

    x = jax.random.normal(kx, (B, S, H), dtype=jnp.float32)
    # nn.Linear default init is uniform(-1/sqrt(H), 1/sqrt(H)); reproduce deterministically.
    bound = 1.0 / (H ** 0.5)
    weight = jax.random.uniform(kw, (E, H), minval=-bound, maxval=bound, dtype=jnp.float32)
    bias = jax.random.uniform(kb, (E,), minval=-bound, maxval=bound, dtype=jnp.float32)

    # Pack once (hoisted), then run the kernel.
    w_t, b_row = pack_params(weight, bias)
    out = emotion_classifier_forward_packed(x, w_t, b_row)
    out = jax.block_until_ready(out)

    # Correctness check against plain-JAX reference.
    ref = x @ weight.T + bias
    assert out.shape == (B, S, E)
    assert jnp.allclose(out, ref, atol=1e-5, rtol=1e-5)

    print("KERNEL_OK")
</pallas_src>

<mosaic_0001>
module attributes {stable_mosaic.version = 11 : i64} {
  func.func @_linear_kernel(%arg0: i32, %arg1: memref<16x32xf32, #tpu.memory_space<vmem>>, %arg2: memref<32x5xf32, #tpu.memory_space<vmem>>, %arg3: memref<1x5xf32, #tpu.memory_space<vmem>>, %arg4: memref<16x5xf32, #tpu.memory_space<vmem>>) attributes {dimension_semantics = [#tpu.dimension_semantics<parallel>], iteration_bounds = array<i64: 1>, scalar_prefetch = 0 : i64, scratch_operands = 0 : i64, tpu.core_type = #tpu.core_type<tc>, window_params = [{transform_indices = @transform_0, window_bounds = array<i64: 16, 32>}, {pipeline_mode = #tpu.pipeline_mode<synchronous>, transform_indices = @transform_1, window_bounds = array<i64: 32, 5>}, {pipeline_mode = #tpu.pipeline_mode<synchronous>, transform_indices = @transform_2, window_bounds = array<i64: 1, 5>}, {transform_indices = @transform_3, window_bounds = array<i64: 16, 5>}]} {
    %c0 = arith.constant 0 : index
    %c0_0 = arith.constant 0 : index
    %0 = vector.load %arg1[%c0, %c0_0] : memref<16x32xf32, #tpu.memory_space<vmem>>, vector<16x32xf32>
    %c0_1 = arith.constant 0 : index
    %c0_2 = arith.constant 0 : index
    %1 = vector.load %arg2[%c0_1, %c0_2] : memref<32x5xf32, #tpu.memory_space<vmem>>, vector<32x5xf32>
    %cst = arith.constant dense<0.000000e+00> : vector<16x5xf32>
    %2 = tpu.matmul %0, %1, %cst {dimension_numbers = #tpu.dot_dimension_numbers<[1], [0], [0], [1], [0, 0, 1, 1], [], []>} : vector<16x32xf32>, vector<32x5xf32>, vector<16x5xf32> -> vector<16x5xf32>
    %c0_3 = arith.constant 0 : index
    %c0_4 = arith.constant 0 : index
    %3 = vector.load %arg3[%c0_3, %c0_4] : memref<1x5xf32, #tpu.memory_space<vmem>>, vector<1x5xf32>
    %4 = vector.broadcast %3 : vector<1x5xf32> to vector<16x5xf32>
    %5 = arith.addf %2, %4 : vector<16x5xf32>
    %c0_5 = arith.constant 0 : index
    %c0_6 = arith.constant 0 : index
    %6 = vector.load %arg4[%c0_5, %c0_6] : memref<16x5xf32, #tpu.memory_space<vmem>>, vector<16x5xf32>
    tpu.vector_store %arg4[%c0_5, %c0_6], %5 {strides = array<i32>} : memref<16x5xf32, #tpu.memory_space<vmem>>, vector<16x5xf32>,
    return
  }
  func.func @transform_0(%arg0: i32) -> (i32, i32) {
    %c0_i32 = arith.constant 0 : i32
    %c0_i32_0 = arith.constant 0 : i32
    return %arg0, %c0_i32 : i32, i32
  }
  func.func @transform_1(%arg0: i32) -> (i32, i32) {
    %c0_i32 = arith.constant 0 : i32
    %c0_i32_0 = arith.constant 0 : i32
    %c0_i32_1 = arith.constant 0 : i32
    return %c0_i32, %c0_i32_0 : i32, i32
  }
  func.func @transform_2(%arg0: i32) -> (i32, i32) {
    %c0_i32 = arith.constant 0 : i32
    %c0_i32_0 = arith.constant 0 : i32
    %c0_i32_1 = arith.constant 0 : i32
    return %c0_i32, %c0_i32_0 : i32, i32
  }
  func.func @transform_3(%arg0: i32) -> (i32, i32) {
    %c0_i32 = arith.constant 0 : i32
    %c0_i32_0 = arith.constant 0 : i32
    return %arg0, %c0_i32 : i32, i32
  }
}

</mosaic_0001>

<bundles_post_ra>
// kernel: tpu_custom_call.1
= control target key start
LH: loop header
LB: loop body
LE: loop exit
PB: predicated region body
PF: predicated region fallthrough
CT: control target
= control target key end

     0   :  { %vm27_vm0 = vcmask 261120   ;;  %vm109_vm1 = vcmask 39936   ;;  %s191_s1 = inlined_call_operand.vmem [shape: f32[32,5], index: 1, kind: input, shape index: {}]   ;;  %s192_s0 = inlined_call_operand.vmem [shape: f32[16,32], index: 0, kind: input, shape index: {}]   ;;  %s193_s2 = inlined_call_operand.vmem [shape: f32[1,5], index: 2, kind: input, shape index: {}]   ;;  %s194_s3 = inlined_call_operand.vmem [shape: f32[16,5], index: 3, kind: output, shape index: {}]  }
   0x1   :  { %v16_v0 = vld [vmem:[%s191_s1] sm:$0xff]  ;;  %v17_v1 = vld [vmem:[%s191_s1 + $0x8] sm:$0xff]  ;;  %v18_v2 = vld [vmem:[%s191_s1 + $0x10] sm:$0xff] }
   0x2   :  { %v136_v3 = vpack.c.bf16 %v17_v1, %v16_v0  ;;  %v19_v4 = vld [vmem:[%s191_s1 + $0x18] sm:$0xff]  ;;  %v14_v5 = vld [vmem:[%s192_s0] sm:$0xff]  ;;  %v15_v7 = vld [vmem:[%s192_s0 + $0x8] sm:$0xff] }
   0x3   :  { %v140_v6 = vpack.c.bf16 %v19_v4, %v18_v2  ;;  %133 = vmatprep.mubr.msk.f32.mxu0 %vm27_vm0, %v14_v5  ;;  %v116_v8 = vld [vmem:[%s193_s2] ss:$0 sm:$0xff] }
   0x4   :  { %137 = vmatprep.subr.bf16.mxu0 %v136_v3 }
   0x5   :  { %139 = vmatpush3.bf16.msra.mxu0 %v136_v3 }
   0x6   :  { %141 = vmatprep.subr.bf16.mxu0 %v140_v6 }
   0x9   :  { %143 = vmatpush3.bf16.msra.mxu0 %v140_v6 }
   0xc   :  { %134 = vmatmul.mubr.msk.f32.vlgmr.msra.gmra.mrb[0].mxu0 %vm27_vm0, %v15_v7 }
  0xdf   :  { %v135_v9 = vpop.f32.mrb[0].mxu0 }
  0xe0   :  { %v106_v10 = vadd.f32 %v135_v9, %v116_v8  ;;  %v100_v11 = vpop.f32.mrb[1].mxu0 }
  0xe1   :  { %v101_v12 = vadd.f32 %v116_v8, %v100_v11 }
  0xe2   :  { %111 = vst.msk [vmem:[%s194_s3 + $0x8] sm:$0xff] %vm109_vm1, %v106_v10 }
  0xe3   :  { %110 = vst.msk [vmem:[%s194_s3] sm:$0xff] %vm109_vm1, %v101_v12 }

</bundles_post_ra>
